<compile_context>
chip_gen: v7x
topology: tpu7x:2x2x1
jax: 0.10.0
libtpu: 0.0.40
codegen_flags: <defaults>
</compile_context>

<pallas_src>
import functools
import numpy as np
import jax
import jax.numpy as jnp
from jax.experimental import pallas as pl
from jax.experimental.pallas import tpu as pltpu


# ----------------------------- tiling helpers -----------------------------

def _round_up(x, m):
    return (x + m - 1) // m * m


def _pick_tile(dim, max_tile, align):
    """Pick a tile size (multiple of `align`, <= max_tile) and padded extent that
    minimizes zero padding; prefer the largest such tile."""
    padded_min = _round_up(max(dim, align), align)
    best_t, best_p = None, None
    t = align
    while t <= min(max_tile, padded_min):
        p = _round_up(padded_min, t)
        if best_p is None or p < best_p or (p == best_p and t > best_t):
            best_t, best_p = t, p
        t += align
    return best_t, best_p


# ----------------------------- Pallas kernels -----------------------------

def _epilogue(acc, s_ref, c_ref, r_ref, relu, o_ref):
    out = acc * s_ref[...] + c_ref[...]          # folded BatchNorm (per-out-channel)
    if r_ref is not None:
        out = out + r_ref[...].astype(jnp.float32)   # fused residual add
    if relu:
        out = jnp.maximum(out, 0.0)
    o_ref[...] = out.astype(o_ref.dtype)


def _conv_mm_kernel(nk, relu, a_ref, b_ref, s_ref, c_ref, o_ref, acc_ref):
    k = pl.program_id(2)

    @pl.when(k == 0)
    def _():
        acc_ref[...] = jnp.zeros_like(acc_ref)

    acc_ref[...] += jnp.dot(a_ref[...], b_ref[...],
                            preferred_element_type=jnp.float32)

    @pl.when(k == nk - 1)
    def _():
        _epilogue(acc_ref[...], s_ref, c_ref, None, relu, o_ref)


def _conv_mm_res_kernel(nk, relu, a_ref, b_ref, s_ref, c_ref, r_ref, o_ref, acc_ref):
    k = pl.program_id(2)

    @pl.when(k == 0)
    def _():
        acc_ref[...] = jnp.zeros_like(acc_ref)

    acc_ref[...] += jnp.dot(a_ref[...], b_ref[...],
                            preferred_element_type=jnp.float32)

    @pl.when(k == nk - 1)
    def _():
        _epilogue(acc_ref[...], s_ref, c_ref, r_ref, relu, o_ref)


def matmul_bn_act(a, b, scale, bias, relu, residual=None):
    """(M,K) x (K,N) in bf16 on the MXU, f32 accumulation, fused BN/residual/ReLU epilogue."""
    M, K = a.shape
    _, N = b.shape
    tm, Mp = _pick_tile(M, 256, 8)
    tn, Np = _pick_tile(N, 256, 128)
    tk, Kp = _pick_tile(K, 512, 128)

    a_p = jnp.pad(a.astype(jnp.bfloat16), ((0, Mp - M), (0, Kp - K)))
    b_p = jnp.pad(b.astype(jnp.bfloat16), ((0, Kp - K), (0, Np - N)))
    # zero-padded scale/bias -> padded output channels stay exactly zero
    s_p = jnp.pad(scale.astype(jnp.float32), (0, Np - N)).reshape(1, Np)
    c_p = jnp.pad(bias.astype(jnp.float32), (0, Np - N)).reshape(1, Np)

    gm, gn, gk = Mp // tm, Np // tn, Kp // tk

    in_specs = [
        pl.BlockSpec((tm, tk), lambda i, j, k: (i, k)),
        pl.BlockSpec((tk, tn), lambda i, j, k: (k, j)),
        pl.BlockSpec((1, tn), lambda i, j, k: (0, j)),
        pl.BlockSpec((1, tn), lambda i, j, k: (0, j)),
    ]
    args = [a_p, b_p, s_p, c_p]

    if residual is not None:
        r_p = jnp.pad(residual.astype(jnp.bfloat16), ((0, Mp - M), (0, Np - N)))
        in_specs.append(pl.BlockSpec((tm, tn), lambda i, j, k: (i, j)))
        args.append(r_p)
        kernel = functools.partial(_conv_mm_res_kernel, gk, relu)
    else:
        kernel = functools.partial(_conv_mm_kernel, gk, relu)

    out_p = pl.pallas_call(
        kernel,
        out_shape=jax.ShapeDtypeStruct((Mp, Np), jnp.bfloat16),
        grid_spec=pltpu.PrefetchScalarGridSpec(
            num_scalar_prefetch=0,
            grid=(gm, gn, gk),
            in_specs=in_specs,
            out_specs=pl.BlockSpec((tm, tn), lambda i, j, k: (i, j)),
            scratch_shapes=[pltpu.VMEM((tm, tn), jnp.float32)],
        ),
        compiler_params=pltpu.CompilerParams(
            dimension_semantics=("parallel", "parallel", "arbitrary"),
            vmem_limit_bytes=32 * 1024 * 1024,
        ),
    )(*args)
    return out_p[:M, :N]


def _head_ce_kernel(n_rows, n_classes, x_ref, w_ref, oh_ref, pred_ref, loss_ref):
    # logits = feats @ W^T (class dim padded to 128 lanes; padded cols masked for softmax)
    logits = jnp.dot(x_ref[...], w_ref[...], preferred_element_type=jnp.float32)
    pred_ref[...] = logits
    col = jax.lax.broadcasted_iota(jnp.int32, logits.shape, 1)
    masked = jnp.where(col < n_classes, logits, -1e30)
    m = jnp.max(masked, axis=-1, keepdims=True)
    lse = m + jnp.log(jnp.sum(jnp.exp(masked - m), axis=-1, keepdims=True))
    tgt = jnp.sum(oh_ref[...] * logits, axis=-1, keepdims=True)
    nll = lse - tgt                                      # (N, 1)
    loss_ref[...] = jnp.sum(nll, axis=0, keepdims=True) / n_rows


def head_cross_entropy(feats, w_t, target, classes):
    Nr = feats.shape[0]
    Cp = _round_up(max(classes, 128), 128)
    w_p = jnp.pad(w_t.astype(jnp.float32), ((0, 0), (0, Cp - classes)))
    onehot = jax.nn.one_hot(target, Cp, dtype=jnp.float32)
    vmem = pl.BlockSpec(memory_space=pltpu.MemorySpace.VMEM)
    pred_p, loss = pl.pallas_call(
        functools.partial(_head_ce_kernel, float(Nr), classes),
        out_shape=(jax.ShapeDtypeStruct((Nr, Cp), jnp.float32),
                   jax.ShapeDtypeStruct((1, 1), jnp.float32)),
        in_specs=[vmem, vmem, vmem],
        out_specs=(vmem, vmem),
    )(feats.astype(jnp.float32), w_p, onehot)
    return pred_p[:, :classes], loss[0, 0]


# ----------------------------- JAX glue (im2col, pooling; NHWC) -----------------------------

def im2col_nhwc(x, kh, kw, stride, pad):
    # x: (N, H, W, C) -> (N*Ho*Wo, kh*kw*C) with (kh, kw, C) minor ordering
    N, H, W, C = x.shape
    xp = jnp.pad(x, ((0, 0), (pad, pad), (pad, pad), (0, 0)))
    Ho = (H + 2 * pad - kh) // stride + 1
    Wo = (W + 2 * pad - kw) // stride + 1
    patches = []
    for i in range(kh):
        for j in range(kw):
            patches.append(xp[:,
                              i:i + stride * (Ho - 1) + 1:stride,
                              j:j + stride * (Wo - 1) + 1:stride, :])  # (N, Ho, Wo, C)
    cols = jnp.stack(patches, axis=3)                  # (N, Ho, Wo, kh*kw, C)
    return cols.reshape(N * Ho * Wo, kh * kw * C), Ho, Wo


def conv_bn(x, w, scale, bias, stride, pad, relu, residual=None):
    # PyTorch conv weight layout (Cout, Cin, kh, kw); NHWC activations
    Cout, Cin, kh, kw = w.shape
    N = x.shape[0]
    cols, Ho, Wo = im2col_nhwc(x, kh, kw, stride, pad)
    wmat = jnp.transpose(w, (2, 3, 1, 0)).reshape(kh * kw * Cin, Cout)
    res2 = None
    if residual is not None:
        res2 = residual.reshape(N * Ho * Wo, Cout)
    out = matmul_bn_act(cols, wmat, scale, bias, relu, res2)   # (N*Ho*Wo, Cout) bf16
    return out.reshape(N, Ho, Wo, Cout)


def max_pool_3x3_s2(x):
    # NHWC max pool
    return jax.lax.reduce_window(
        x, jnp.array(-jnp.inf, x.dtype), jax.lax.max,
        window_dimensions=(1, 3, 3, 1),
        window_strides=(1, 2, 2, 1),
        padding=((0, 0), (1, 1), (1, 1), (0, 0)))


# ----------------------------- Parameters (deterministic init) -----------------------------

def _fold_bn(gamma, beta, running_mean, running_var, eps=1e-5):
    scale = gamma / jnp.sqrt(running_var + eps)
    bias = beta - running_mean * scale
    return scale, bias


def init_params(key, classes):
    keys = iter(jax.random.split(key, 128))

    def conv_w(cout, cin, kh, kw):
        fan_in = cin * kh * kw
        return jax.random.normal(next(keys), (cout, cin, kh, kw),
                                 jnp.float32) * np.sqrt(2.0 / fan_in)

    def bn(c):
        k1, k2 = jax.random.split(next(keys))
        gamma = 1.0 + 0.1 * jax.random.normal(k1, (c,), jnp.float32)
        beta = 0.05 * jax.random.normal(k2, (c,), jnp.float32)
        return _fold_bn(gamma, beta, jnp.zeros((c,), jnp.float32),
                        jnp.ones((c,), jnp.float32))

    params = {'conv1': conv_w(64, 3, 7, 7), 'bn1': bn(64), 'layers': []}
    layer_cfg = [(64, 64, 1), (64, 128, 2), (128, 256, 2), (256, 512, 2)]
    for (cin, cout, stride) in layer_cfg:
        blocks = []
        for bidx in range(2):
            s = stride if bidx == 0 else 1
            ci = cin if bidx == 0 else cout
            blk = {
                'conv1': conv_w(cout, ci, 3, 3), 'bn1': bn(cout),
                'conv2': conv_w(cout, cout, 3, 3), 'bn2': bn(cout),
                'stride': s,
            }
            if s != 1 or ci != cout:
                blk['down_conv'] = conv_w(cout, ci, 1, 1)
                blk['down_bn'] = bn(cout)
            blocks.append(blk)
        params['layers'].append(blocks)
    # head: nn.Linear(512, classes, bias=False) -> weight (classes, 512)
    params['head'] = jax.random.normal(next(keys), (classes, 512),
                                       jnp.float32) * np.sqrt(1.0 / 512)
    return params


# ----------------------------- Forward (== ClassificationNetwork.forward) -----------------------------

def classification_forward(params, data, target, classes):
    # boundary: NCHW f32 (PyTorch interface) -> NHWC bf16 (channels on the 128-lane axis)
    x = jnp.transpose(data, (0, 2, 3, 1)).astype(jnp.bfloat16)

    # encoder (resnet18 with fc = Identity)
    x = conv_bn(x, params['conv1'], *params['bn1'], stride=2, pad=3, relu=True)
    x = max_pool_3x3_s2(x)
    for blocks in params['layers']:
        for blk in blocks:
            s = blk['stride']
            if 'down_conv' in blk:
                identity = conv_bn(x, blk['down_conv'], *blk['down_bn'],
                                   stride=s, pad=0, relu=False)
            else:
                identity = x
            out = conv_bn(x, blk['conv1'], *blk['bn1'], stride=s, pad=1, relu=True)
            # conv2 + folded BN + residual add + ReLU fused in one kernel epilogue
            x = conv_bn(out, blk['conv2'], *blk['bn2'], stride=1, pad=1,
                        relu=True, residual=identity)

    feats = jnp.mean(x.astype(jnp.float32), axis=(1, 2))      # adaptive avg pool -> (N, 512)

    # head + loss (CrossEntropyLoss, mean reduction) in a single Pallas kernel
    pred, loss = head_cross_entropy(feats, params['head'].T, target, classes)
    return pred, loss


# ----------------------------- Demo -----------------------------

if __name__ == "__main__":
    key = jax.random.PRNGKey(0)
    pkey, dkey, tkey = jax.random.split(key, 3)
    classes = 10
    params = init_params(pkey, classes)

    data = jax.random.normal(dkey, (2, 3, 32, 32), jnp.float32)   # NCHW like PyTorch
    target = jax.random.randint(tkey, (2,), 0, classes)

    pred, loss = classification_forward(params, data, target, classes)
    jax.block_until_ready((pred, loss))
    assert pred.shape == (2, classes) and loss.shape == ()
    assert bool(jnp.isfinite(loss)) and bool(jnp.all(jnp.isfinite(pred)))
    print("KERNEL_OK")
</pallas_src>

<mosaic_0001>
module attributes {stable_mosaic.version = 11 : i64} {
  func.func @_conv_mm_kernel(%arg0: i32, %arg1: i32, %arg2: i32, %arg3: memref<256x256xbf16, #tpu.memory_space<vmem>>, %arg4: memref<256x128xbf16, #tpu.memory_space<vmem>>, %arg5: memref<1x128xf32, #tpu.memory_space<vmem>>, %arg6: memref<1x128xf32, #tpu.memory_space<vmem>>, %arg7: memref<256x128xbf16, #tpu.memory_space<vmem>>, %arg8: memref<256x128xf32, #tpu.memory_space<vmem>>) attributes {dimension_semantics = [#tpu.dimension_semantics<parallel>, #tpu.dimension_semantics<parallel>, #tpu.dimension_semantics<arbitrary>], iteration_bounds = array<i64: 2, 1, 1>, scalar_prefetch = 0 : i64, scratch_operands = 1 : i64, tpu.core_type = #tpu.core_type<tc>, window_params = [{transform_indices = @transform_0, window_bounds = array<i64: 256, 256>}, {transform_indices = @transform_1, window_bounds = array<i64: 256, 128>}, {transform_indices = @transform_2, window_bounds = array<i64: 1, 128>}, {transform_indices = @transform_3, window_bounds = array<i64: 1, 128>}, {transform_indices = @transform_4, window_bounds = array<i64: 256, 128>}]} {
    %c0_i32 = arith.constant 0 : i32
    %0 = arith.cmpi eq, %arg2, %c0_i32 : i32
    %1 = arith.extui %0 : i1 to i32
    %c0_i32_0 = arith.constant 0 : i32
    %2 = arith.cmpi ne, %1, %c0_i32_0 : i32
    scf.if %2 {
      %cst_10 = arith.constant 0.000000e+00 : f32
      %12 = vector.broadcast %cst_10 : f32 to vector<256x128xf32>
      %c0_11 = arith.constant 0 : index
      %c0_12 = arith.constant 0 : index
      %13 = vector.load %arg8[%c0_11, %c0_12] : memref<256x128xf32, #tpu.memory_space<vmem>>, vector<256x128xf32>
      tpu.vector_store %arg8[%c0_11, %c0_12], %12 {strides = array<i32>} : memref<256x128xf32, #tpu.memory_space<vmem>>, vector<256x128xf32>,
    } else {
    }
    %c0 = arith.constant 0 : index
    %c0_1 = arith.constant 0 : index
    %3 = vector.load %arg8[%c0, %c0_1] : memref<256x128xf32, #tpu.memory_space<vmem>>, vector<256x128xf32>
    %c0_2 = arith.constant 0 : index
    %c0_3 = arith.constant 0 : index
    %4 = vector.load %arg3[%c0_2, %c0_3] : memref<256x256xbf16, #tpu.memory_space<vmem>>, vector<256x256xbf16>
    %c0_4 = arith.constant 0 : index
    %c0_5 = arith.constant 0 : index
    %5 = vector.load %arg4[%c0_4, %c0_5] : memref<256x128xbf16, #tpu.memory_space<vmem>>, vector<256x128xbf16>
    %cst = arith.constant dense<0.000000e+00> : vector<256x128xf32>
    %6 = tpu.matmul %4, %5, %cst {dimension_numbers = #tpu.dot_dimension_numbers<[1], [0], [0], [1], [0, 0, 1, 1], [], []>} : vector<256x256xbf16>, vector<256x128xbf16>, vector<256x128xf32> -> vector<256x128xf32>
    %7 = arith.addf %3, %6 : vector<256x128xf32>
    %c0_6 = arith.constant 0 : index
    %c0_7 = arith.constant 0 : index
    %8 = vector.load %arg8[%c0_6, %c0_7] : memref<256x128xf32, #tpu.memory_space<vmem>>, vector<256x128xf32>
    tpu.vector_store %arg8[%c0_6, %c0_7], %7 {strides = array<i32>} : memref<256x128xf32, #tpu.memory_space<vmem>>, vector<256x128xf32>,
    %c0_i32_8 = arith.constant 0 : i32
    %9 = arith.cmpi eq, %arg2, %c0_i32_8 : i32
    %10 = arith.extui %9 : i1 to i32
    %c0_i32_9 = arith.constant 0 : i32
    %11 = arith.cmpi ne, %10, %c0_i32_9 : i32
    scf.if %11 {
      %c0_10 = arith.constant 0 : index
      %c0_11 = arith.constant 0 : index
      %12 = vector.load %arg8[%c0_10, %c0_11] : memref<256x128xf32, #tpu.memory_space<vmem>>, vector<256x128xf32>
      %c0_12 = arith.constant 0 : index
      %c0_13 = arith.constant 0 : index
      %13 = vector.load %arg5[%c0_12, %c0_13] : memref<1x128xf32, #tpu.memory_space<vmem>>, vector<1x128xf32>
      %14 = vector.broadcast %13 : vector<1x128xf32> to vector<256x128xf32>
      %15 = arith.mulf %12, %14 : vector<256x128xf32>
      %c0_14 = arith.constant 0 : index
      %c0_15 = arith.constant 0 : index
      %16 = vector.load %arg6[%c0_14, %c0_15] : memref<1x128xf32, #tpu.memory_space<vmem>>, vector<1x128xf32>
      %17 = vector.broadcast %16 : vector<1x128xf32> to vector<256x128xf32>
      %18 = arith.addf %15, %17 : vector<256x128xf32>
      %cst_16 = arith.constant 0.000000e+00 : f32
      %19 = vector.broadcast %cst_16 : f32 to vector<256x128xf32>
      %20 = arith.maximumf %18, %19 : vector<256x128xf32>
      %21 = arith.truncf %20 : vector<256x128xf32> to vector<256x128xbf16>
      %c0_17 = arith.constant 0 : index
      %c0_18 = arith.constant 0 : index
      %22 = vector.load %arg7[%c0_17, %c0_18] : memref<256x128xbf16, #tpu.memory_space<vmem>>, vector<256x128xbf16>
      tpu.vector_store %arg7[%c0_17, %c0_18], %21 {strides = array<i32>} : memref<256x128xbf16, #tpu.memory_space<vmem>>, vector<256x128xbf16>,
    } else {
    }
    return
  }
  func.func @transform_0(%arg0: i32, %arg1: i32, %arg2: i32) -> (i32, i32) {
    %c0_i32 = arith.constant 0 : i32
    return %arg0, %arg2 : i32, i32
  }
  func.func @transform_1(%arg0: i32, %arg1: i32, %arg2: i32) -> (i32, i32) {
    %c0_i32 = arith.constant 0 : i32
    return %arg2, %arg1 : i32, i32
  }
  func.func @transform_2(%arg0: i32, %arg1: i32, %arg2: i32) -> (i32, i32) {
    %c0_i32 = arith.constant 0 : i32
    %c0_i32_0 = arith.constant 0 : i32
    return %c0_i32, %arg1 : i32, i32
  }
  func.func @transform_3(%arg0: i32, %arg1: i32, %arg2: i32) -> (i32, i32) {
    %c0_i32 = arith.constant 0 : i32
    %c0_i32_0 = arith.constant 0 : i32
    return %c0_i32, %arg1 : i32, i32
  }
  func.func @transform_4(%arg0: i32, %arg1: i32, %arg2: i32) -> (i32, i32) {
    %c0_i32 = arith.constant 0 : i32
    return %arg0, %arg1 : i32, i32
  }
}

</mosaic_0001>

<bundles_post_ra>
// kernel: tpu_custom_call.1
= control target key start
LH: loop header
LB: loop body
LE: loop exit
PB: predicated region body
PF: predicated region fallthrough
CT: control target
= control target key end

     0   :  { %9 = vsyncpa [#allocation4], 0  ;;  %s2391_s0 = inlined_call_operand.hbm [shape: bf16[512,256], index: 0, kind: input, shape index: {}]   ;;  %s2392_s1 = inlined_call_operand.hbm [shape: bf16[256,128], index: 1, kind: input, shape index: {}]   ;;  %s2393_s2 = inlined_call_operand.vmem [shape: f32[1,128], index: 2, kind: input, shape index: {}]   ;;  %s2394_s3 = inlined_call_operand.vmem [shape: f32[1,128], index: 3, kind: input, shape index: {}]   ;;  %s2395_s4 = inlined_call_operand.hbm [shape: bf16[512,128], index: 4, kind: output, shape index: {}]  }
   0x1   :  { %11 = vsyncpa [#allocation4 + $0x1], 0 }
   0x2   :  { %12 = vsyncpa [#allocation7], 0 }
   0x3   :  { %13 = vsyncpa [#allocation5], 0 }
   0x4   :  { %15 = vsyncpa [#allocation5 + $0x1], 0  ;;  %s2044_s15 = smov 0   ;;  %s2046_s16 = smov 0  }
   0x5   :  { %s2048_s17 = smov 0   ;;  %s2050_s18 = smov 0  }
   0x6   :  { %s2052_s19 = smov 0   ;;  %s2054_s20 = smov 0  }
   0x7 LB: > { %s1361_s21 = sadd.s32 4294967295, %s2008_s20   ;;  %s1362_s22 = sadd.s32 4294967294, %s2008_s20   ;;  %s2008_s20 = sphi %s2054_s20, %s21_s20   ;;  %s2004_s19 = sphi %s2052_s19, %s2419_s19   ;;  %s2000_s18 = sphi %s2050_s18, %s2418_s18   ;;  %s1996_s17 = sphi %s2048_s17, %s2417_s17   ;;  %s1992_s16 = sphi %s2046_s16, %s2416_s16   ;;  %s1988_s15 = sphi %s2044_s15, %s2415_s15  }
   0x8   : > { %p62_p0 = scmp.ne.s32.totalorder %s1992_s16, %s1988_s15  ;;  %p2078_p1 = scmp.eq.s32.totalorder %s1361_s21, 0 }
   0x9   : > { %p2082_p2 = scmp.eq.s32.totalorder %s1361_s21, 1  ;;  %p174_p3 = scmp.eq.s32.totalorder %s1362_s22, 1 }
   0xa   : > { %s2400_s23 = scalar_select %p2078_p1, 1, 0 }
   0xb   : > { %s2401_s24 = scalar_select %p2082_p2, 1, 0 }
   0xc   : > { %p2088_p4 = por %p2078_p1, %p62_p0  ;;  %p1363_p5 = scmp.ge.s32.totalorder %s2008_s20, 1 }
   0xd   : > { %p2093_p6 = por %p174_p3, %p62_p0  ;;  %p181_p7 = scmp.lt.s32.totalorder %s2008_s20, 3 }
   0xe   : > { %s2402_s25 = scalar_select %p2088_p4, 1, 0 }
   0xf   : > { %s2403_s26 = scalar_select %p2093_p6, 1, 0 }
  0x10   : > { %p2098_p8 = pnand %p1363_p5, %p181_p7  ;;  %s2010_s28 = smov [#allocation6]  }
  0x11   : > { %s197_s29 = sshll.u32 %s2010_s28, 4  ;;  %s40_s5 = sadd.s32 1, %s2004_s19  ;;  %s198_s29 = int_to_ptr.vmem [resolvable:$true] %s197_s29 }
  0x12   : > { %s2404_s27 = scalar_select %p2098_p8, 1, 0 }
  0x13   : > { %p1729_p9 = pneg %p2098_p8  ;;  %s1864_s8 = scalar_lea.hbm %s2392_s1, 2048 }
  0x14   : > { %p1865_p12 = scmp.ne.s32.totalorder %s2392_s1, %s1864_s8  ;;  %p1871_p5 = scmp.lt.u32.totalorder %s1864_s8, %s2392_s1 }
  0x15   : > { %p2107_p11 = pnand %p1729_p9, %p2078_p1 }
  0x17   : > { %p1866_p13 = pneg %p2107_p11 }
  0x19   : > { %p1867_p0 = pnand %p1866_p13, %p1865_p12 }
  0x1b   : > { %p1868_p3 = pneg %p1867_p0 }
  0x1d   : > { %p1873_p7 = pnand %p1871_p5, %p1868_p3 }
  0x1f   : > { %1876 = shalt.err (!%p1873_p7)
}
  0x20   : > { %s1877_s13 = scalar_lea.vmem %s198_s29, 2048  ;;  %p1885_p1 = scmp.lt.s32.totalorder %s198_s29, %s198_s29 }
  0x21   : > { %p1878_p9 = scmp.ne.s32.totalorder %s198_s29, %s1877_s13  ;;  %p1886_p4 = scmp.lt.s32.totalorder %s1877_s13, %s1877_s13 }
  0x23   : > { %p1880_p10 = pnand %p1878_p9, %p1866_p13  ;;  %p1887_p8 = por %p1886_p4, %p1885_p1 }
  0x25   : > { %p1881_p6 = pneg %p1880_p10 }
  0x27   : > { %p1888_p2 = pnand %p1887_p8, %p1881_p6 }
  0x29   : > { %1891 = shalt.err (!%p1888_p2)
}
  0x2a   : > { %s2011_s14 = smov 64   ;;  %s2012_s21 = smov 4  }
  0x2b   : > { %1732 = dma.hbm_to_vmem [thread:$0]  (!%p2107_p11), %s2392_s1, 2048, %s198_s29, [#allocation7], %s2011_s14, %s2011_s14, %s2012_s21  }
  0x2c   : > { %p42_p1 = scmp.ge.s32.totalorder %s40_s5, 2  ;;  %s49_s6 = sadd.s32 1, %s1996_s17 }
  0x2d   : > { %p56_p2 = scmp.ne.s32.totalorder %s1996_s17, %s1992_s16  ;;  %p57_p4 = scmp.eq.s32.totalorder %s2008_s20, 0 }
  0x2e   : > { %s2421_s5 = smov (%p42_p1, %s40_s5), 0  ;;  %p2407_p8 = scmp.ne.s32.totalorder %s2401_s24, 0 }
  0x2f   : > { %p2134_p6 = por %p57_p4, %p56_p2  ;;  %s44_s30 = ssub.s32 %s2004_s19, %s2421_s5 }
  0x30   : > { %p2140_p10 = por %p2407_p8, %p56_p2  ;;  %p1742_p12 = scmp.lt.s32.totalorder %s2008_s20, 2 }
  0x31   : > { %p47_p11 = scmp.eq.s32.totalorder %s44_s30, 0  ;;  %s223_s29 = sand.u32 1, %s1996_s17  }
  0x32   : > { %s1368_s9 = sshll.u32 %s223_s29, 8  ;;  %s1464_s11 = sshll.u32 %s2004_s19, 12 }
  0x33   : > { %s2149_s10 = scalar_select %p47_p11, %s1996_s17, %s49_s6  }
  0x34   : > { %s2155_s14 = scalar_lea.hbm %s2391_s0, %s1464_s11  ;;  %s227_s24 = scalar_lea.vmem [#allocation3], %s1368_s9 }
  0x35   : > { %s237_s21 = sshll.u32 %s227_s24, 4  ;;  %p2161_p13 = pnand %p1742_p12, %p2134_p6  ;;  %s2157_s21 = int_to_ptr.vmem [resolvable:$true] %s237_s21 }
  0x36   : > { %s2165_s28 = scalar_lea.sflag [#allocation4], %s223_s29  ;;  %s1892_s6 = scalar_lea.hbm %s2155_s14, 4096 }
  0x37   : > { %p1893_p0 = scmp.ne.s32.totalorder %s2155_s14, %s1892_s6  ;;  %p1894_p3 = pneg %p2161_p13 }
  0x38   : > { %s1897_s7 = scalar_lea.hbm %s2391_s0, 8192  ;;  %p1898_p9 = scmp.lt.u32.totalorder %s2155_s14, %s2391_s0 }
  0x39   : > { %p1895_p5 = pnand %p1894_p3, %p1893_p0  ;;  %p1899_p1 = scmp.lt.u32.totalorder %s1897_s7, %s1892_s6 }
  0x3a   : > { %p1901_p4 = scmp.lt.u32.totalorder %s1892_s6, %s2155_s14 }
  0x3b   : > { %p1896_p7 = pneg %p1895_p5  ;;  %p1900_p2 = por %p1899_p1, %p1898_p9 }
  0x3d   : > { %p1902_p6 = por %p1901_p4, %p1900_p2 }
  0x3f   : > { %p1903_p8 = pnand %p1902_p6, %p1896_p7 }
  0x41   : > { %1906 = shalt.err (!%p1903_p8)
}
  0x42   : > { %s1907_s29 = scalar_lea.vmem %s2157_s21, 4096  ;;  %s2013_s13 = smov [#allocation3]  }
  0x43   : > { %p1908_p12 = scmp.ne.s32.totalorder %s2157_s21, %s1907_s29  ;;  %s1912_s24 = sshll.u32 %s2013_s13, 4  ;;  %s1913_s24 = int_to_ptr.vmem [resolvable:$false] %s1912_s24 }
  0x44   : > { %s1914_s30 = scalar_lea.vmem %s1913_s24, 8192  ;;  %p1915_p5 = scmp.lt.s32.totalorder %s2157_s21, %s1913_s24 }
  0x45   : > { %p1910_p11 = pnand %p1908_p12, %p1894_p3  ;;  %p1916_p9 = scmp.lt.s32.totalorder %s1914_s30, %s1907_s29 }
  0x47   : > { %p1911_p0 = pneg %p1910_p11  ;;  %p1917_p1 = por %p1916_p9, %p1915_p5 }
  0x49   : > { %p1918_p2 = pnand %p1917_p1, %p1911_p0 }
  0x4b   : > { %1921 = shalt.err (!%p1918_p2)
}
  0x4c   : > { %s2014_s6 = smov 128   ;;  %s2015_s9 = smov 8  }
  0x4d   : > { %1736 = dma.hbm_to_vmem [thread:$0]  (!%p2161_p13), %s2155_s14, 4096, %s2157_s21, %s2165_s28, %s2014_s6, %s2014_s6, %s2015_s9  }
  0x4e   : > { %p2410_p3 = scmp.ne.s32.totalorder %s2404_s27, 0 }
  0x4f   : > { %s2196_s7 = sand.u32 (!%p2410_p3), 1, %s1992_s16   ;;  %p2411_p7 = scmp.ne.s32.totalorder (!%p2410_p3), %s2402_s25, 0 }
  0x50   : > { %249 = sbr.rel (%p2410_p3) target bundleno = 421 (0x1a5), region = 36  ;;  %s1373_s11 = sshll.u32 (!%p2410_p3), %s2196_s7, 8 }
  0x51   : > { %s252_s12 = scalar_lea.sflag (!%p2410_p3), [#allocation4], %s2196_s7  ;;  %s2200_s29 = scalar_lea.vmem (!%p2410_p3), [#allocation3], %s1373_s11 }
  0x57   : > { %1975 = dma.done.wait (%p2411_p7), %s252_s12, 4096  }
  0x58   : > { %1977 = vsyncadd (%p2411_p7), %s252_s12, 4294963200  ;;  %p2412_p13 = scmp.ne.s32.totalorder %s2400_s23, 0 }
  0x5a   : > { %1979 = dma.done.wait (%p2412_p13), [#allocation7], 2048  }
  0x5b   : > { %1981 = vsyncadd (%p2412_p13), [#allocation7], 4294965248  ;;  %v1800_v0 = vld [vmem:[#allocation6 + $0x40] sm:$0xff]   ;;  %v1802_v2 = vld [vmem:[#allocation6 + $0x48] sm:$0xff]   ;;  %s1375_s21 = sshll.u32 %s2196_s7, 7  ;;  %s1497_s28 = sshll.u32 %s2000_s18, 11 }
  0x5c   : > { %v1801_v1 = vld [vmem:[#allocation6] sm:$0xff]   ;;  %1593 = vmatprep.subr.bf16.mxu0 %v1800_v0  ;;  %1705 = vmatprep.subr.bf16.mxu1 %v1800_v0  ;;  %v1803_v3 = vld [vmem:[#allocation6 + $0x8] sm:$0xff]   ;;  %v1804_v4 = vld [vmem:[#allocation6 + $0x50] sm:$0xff]   ;;  %s2263_s22 = scalar_lea.vmem [#allocation8], %s1375_s21  ;;  %s2338_s6 = scalar_lea.hbm %s2395_s4, %s1497_s28 }
  0x5d   : > { %1594 = vmatpush3.bf16.msra.mxu0 %v1801_v1  ;;  %1713 = vmatpush3.bf16.msra.mxu1 %v1801_v1  ;;  %v1805_v5 = vld [vmem:[#allocation6 + $0x10] sm:$0xff]   ;;  %v1806_v6 = vld [vmem:[#allocation6 + $0x58] sm:$0xff]   ;;  %v1808_v8 = vld [vmem:[#allocation6 + $0x60] sm:$0xff]   ;;  %s1234_s13 = sshll.u32 %s2263_s22, 4  ;;  %s1220_s18 = scalar_lea.sflag [#allocation5], %s2196_s7  ;;  %s2340_s13 = int_to_ptr.vmem [resolvable:$true] %s1234_s13 }
  0x5e   : > { %1595 = vmatprep.subr.bf16.mxu0 %v1802_v2  ;;  %1706 = vmatprep.subr.bf16.mxu1 %v1802_v2  ;;  %v1807_v7 = vld [vmem:[#allocation6 + $0x18] sm:$0xff]   ;;  %v1809_v9 = vld [vmem:[#allocation6 + $0x20] sm:$0xff]   ;;  %v1810_v10 = vld [vmem:[#allocation6 + $0x68] sm:$0xff]   ;;  %s1922_s9 = scalar_lea.vmem %s2340_s13, 2048  ;;  %s2016_s11 = smov [#allocation8]  }
  0x5f   : > { %v1818_v11 = vld [vmem:[%s2200_s29 + $0x4] ss:$8 sps:$4 sm:$0xff]   ;;  %v1812_v14 = vld [vmem:[#allocation6 + $0x70] sm:$0xff]   ;;  %v1814_v16 = vld [vmem:[#allocation6 + $0x78] sm:$0xff]   ;;  %p1923_p4 = scmp.ne.s32.totalorder %s2340_s13, %s1922_s9  ;;  %s1926_s12 = sshll.u32 %s2016_s11, 4  ;;  %s1927_s12 = int_to_ptr.vmem [resolvable:$false] %s1926_s12 }
  0x60   : > { %v1821_v12 = vld [vmem:[%s2200_s29 + $0x84] ss:$8 sps:$4 sm:$0xff]   ;;  %721 = vmatprep.mubr.bf16.mxu0 %v1818_v11  ;;  %v1813_v15 = vld [vmem:[#allocation6 + $0x30] sm:$0xff]   ;;  %v1815_v17 = vld [vmem:[#allocation6 + $0x38] sm:$0xff]   ;;  %p1929_p12 = scmp.lt.s32.totalorder %s2340_s13, %s1927_s12 }
  0x61   : > { %1596 = vmatpush3.bf16.msra.mxu0 %v1803_v3  ;;  %1714 = vmatpush3.bf16.msra.mxu1 %v1803_v3  ;;  %v1811_v13 = vld [vmem:[#allocation6 + $0x28] sm:$0xff]   ;;  %v1822_v20 = vld [vmem:[%s2200_s29 + $0x14] ss:$8 sps:$4 sm:$0xff]   ;;  %v1826_v22 = vld [vmem:[%s2200_s29 + $0x10] ss:$8 sps:$4 sm:$0xff]   ;;  %p1924_p6 = pnand %p1923_p4, %p2140_p10 }
  0x62   : > { %1597 = vmatprep.subr.bf16.mxu0 %v1804_v4  ;;  %1707 = vmatprep.subr.bf16.mxu1 %v1804_v4  ;;  %v1816_v18 = vld [vmem:[%s2200_s29] ss:$8 sps:$4 sm:$0xff]   ;;  %v1824_v21 = vld [vmem:[%s2200_s29 + $0x94] ss:$8 sps:$4 sm:$0xff]   ;;  %v1827_v23 = vld [vmem:[%s2200_s29 + $0x90] ss:$8 sps:$4 sm:$0xff]  }
  0x63   : > { %785 = vmatprep.mubr.bf16.mxu1 %v1821_v12  ;;  %v1819_v19 = vld [vmem:[%s2200_s29 + $0x80] ss:$8 sps:$4 sm:$0xff]   ;;  %v1828_v24 = vld [vmem:[%s2200_s29 + $0x24] ss:$8 sps:$4 sm:$0xff]   ;;  %v1834_v28 = vld [vmem:[%s2200_s29 + $0x34] ss:$8 sps:$4 sm:$0xff]   ;;  %p1925_p8 = pneg %p1924_p6 }
  0x64   : > { %v1830_v25 = vld [vmem:[%s2200_s29 + $0xa4] ss:$8 sps:$4 sm:$0xff]   ;;  %v1832_v26 = vld [vmem:[%s2200_s29 + $0x20] ss:$8 sps:$4 sm:$0xff]   ;;  %v1836_v29 = vld [vmem:[%s2200_s29 + $0xb4] ss:$8 sps:$4 sm:$0xff]  }
  0x65   : > { %1598 = vmatpush3.bf16.msra.mxu0 %v1805_v5  ;;  %1715 = vmatpush3.bf16.msra.mxu1 %v1805_v5  ;;  %v1833_v27 = vld [vmem:[%s2200_s29 + $0xa0] ss:$8 sps:$4 sm:$0xff]   ;;  %v1838_v30 = vld [vmem:[%s2200_s29 + $0x30] ss:$8 sps:$4 sm:$0xff]   ;;  %v1840_v32 = vld [vmem:[%s2200_s29 + $0x44] ss:$8 sps:$4 sm:$0xff]  }
  0x66   : > { %1599 = vmatprep.subr.bf16.mxu0 %v1806_v6  ;;  %1708 = vmatprep.subr.bf16.mxu1 %v1806_v6  ;;  %v1839_v31 = vld [vmem:[%s2200_s29 + $0xb0] ss:$8 sps:$4 sm:$0xff]   ;;  %v1842_v33 = vld [vmem:[%s2200_s29 + $0xc4] ss:$8 sps:$4 sm:$0xff]   ;;  %v1844_v34 = vld [vmem:[%s2200_s29 + $0x40] ss:$8 sps:$4 sm:$0xff]  }
  0x67   : > { %v1845_v35 = vld [vmem:[%s2200_s29 + $0xc0] ss:$8 sps:$4 sm:$0xff]   ;;  %v1846_v36 = vld [vmem:[%s2200_s29 + $0x54] ss:$8 sps:$4 sm:$0xff]   ;;  %v1850_v38 = vld [vmem:[%s2200_s29 + $0x50] ss:$8 sps:$4 sm:$0xff]  }
  0x68   : > { %v1848_v37 = vld [vmem:[%s2200_s29 + $0xd4] ss:$8 sps:$4 sm:$0xff]   ;;  %v1851_v39 = vld [vmem:[%s2200_s29 + $0xd0] ss:$8 sps:$4 sm:$0xff]   ;;  %v1852_v40 = vld [vmem:[%s2200_s29 + $0x64] ss:$8 sps:$4 sm:$0xff]  }
  0x69   : > { %1600 = vmatpush3.bf16.msra.mxu0 %v1807_v7  ;;  %1716 = vmatpush3.bf16.msra.mxu1 %v1807_v7  ;;  %v1854_v41 = vld [vmem:[%s2200_s29 + $0xe4] ss:$8 sps:$4 sm:$0xff]   ;;  %v1856_v42 = vld [vmem:[%s2200_s29 + $0x60] ss:$8 sps:$4 sm:$0xff]   ;;  %v1858_v44 = vld [vmem:[%s2200_s29 + $0x74] ss:$8 sps:$4 sm:$0xff]  }
  0x6a   : > { %1601 = vmatprep.subr.bf16.mxu0 %v1808_v8  ;;  %1709 = vmatprep.subr.bf16.mxu1 %v1808_v8  ;;  %v1857_v43 = vld [vmem:[%s2200_s29 + $0xe0] ss:$8 sps:$4 sm:$0xff]   ;;  %v1860_v45 = vld [vmem:[%s2200_s29 + $0xf4] ss:$8 sps:$4 sm:$0xff]   ;;  %v1862_v46 = vld [vmem:[%s2200_s29 + $0x70] ss:$8 sps:$4 sm:$0xff]  }
  0x6b   : > { %v1863_v47 = vld [vmem:[%s2200_s29 + $0xf0] ss:$8 sps:$4 sm:$0xff]   ;;  %v2245_v51 = vld [vmem:[%s2393_s2] ss:$0 sm:$0xff]  ;;  %s1928_s29 = scalar_lea.vmem %s1927_s12, 4096 }
  0x6c   : > { %v2250_v57 = vld [vmem:[%s2394_s3] ss:$0 sm:$0xff]  ;;  %p1930_p11 = scmp.lt.s32.totalorder %s1928_s29, %s1922_s9 }
  0x6d   : > { %1602 = vmatpush3.bf16.msra.mxu0 %v1809_v9  ;;  %1717 = vmatpush3.bf16.msra.mxu1 %v1809_v9 }
  0x6e   : > { %1603 = vmatprep.subr.bf16.mxu0 %v1810_v10  ;;  %1710 = vmatprep.subr.bf16.mxu1 %v1810_v10  ;;  %p1931_p0 = por %p1930_p11, %p1929_p12 }
  0x70   : > { %p1932_p5 = pnand %p1931_p0, %p1925_p8 }
  0x71   : > { %1604 = vmatpush3.bf16.msra.mxu0 %v1811_v13  ;;  %1718 = vmatpush3.bf16.msra.mxu1 %v1811_v13 }
  0x72   : > { %1605 = vmatprep.subr.bf16.mxu0 %v1812_v14  ;;  %1711 = vmatprep.subr.bf16.mxu1 %v1812_v14 }
  0x75   : > { %1606 = vmatpush3.bf16.msra.mxu0 %v1813_v15  ;;  %1719 = vmatpush3.bf16.msra.mxu1 %v1813_v15 }
  0x76   : > { %1607 = vmatprep.subr.bf16.mxu0 %v1814_v16  ;;  %1712 = vmatprep.subr.bf16.mxu1 %v1814_v16 }
  0x79   : > { %1608 = vmatpush3.bf16.msra.mxu0 %v1815_v17  ;;  %1720 = vmatpush3.bf16.msra.mxu1 %v1815_v17 }
  0x7c   : > { %722 = vmatmul.mubr.bf16.vlgmr.msra.gmra.mrb[0].mxu0 %v1816_v18  ;;  %786 = vmatmul.mubr.bf16.vlgmr.msra.gmra.mrb[0].mxu1 %v1819_v19 }
  0x7d   : > { %729 = vmatprep.mubr.bf16.mxu0 %v1822_v20  ;;  %793 = vmatprep.mubr.bf16.mxu1 %v1824_v21 }
  0x84   : > { %730 = vmatmul.mubr.bf16.gmra.mrb[4].mxu0 %v1826_v22  ;;  %794 = vmatmul.mubr.bf16.gmra.mrb[4].mxu1 %v1827_v23 }
  0x85   : > { %737 = vmatprep.mubr.bf16.mxu0 %v1828_v24  ;;  %801 = vmatprep.mubr.bf16.mxu1 %v1830_v25 }
  0x8c   : > { %738 = vmatmul.mubr.bf16.gmra.mrb[8].mxu0 %v1832_v26  ;;  %802 = vmatmul.mubr.bf16.gmra.mrb[8].mxu1 %v1833_v27 }
  0x8d   : > { %745 = vmatprep.mubr.bf16.mxu0 %v1834_v28  ;;  %809 = vmatprep.mubr.bf16.mxu1 %v1836_v29 }
  0x94   : > { %746 = vmatmul.mubr.bf16.gmra.mrb[12].mxu0 %v1838_v30  ;;  %810 = vmatmul.mubr.bf16.gmra.mrb[12].mxu1 %v1839_v31 }
  0x95   : > { %753 = vmatprep.mubr.bf16.mxu0 %v1840_v32  ;;  %817 = vmatprep.mubr.bf16.mxu1 %v1842_v33 }
  0x9c   : > { %754 = vmatmul.mubr.bf16.gmra.mrb[16].mxu0 %v1844_v34  ;;  %818 = vmatmul.mubr.bf16.gmra.mrb[16].mxu1 %v1845_v35 }
  0x9d   : > { %761 = vmatprep.mubr.bf16.mxu0 %v1846_v36  ;;  %825 = vmatprep.mubr.bf16.mxu1 %v1848_v37 }
  0xa4   : > { %762 = vmatmul.mubr.bf16.gmra.mrb[20].mxu0 %v1850_v38  ;;  %826 = vmatmul.mubr.bf16.gmra.mrb[20].mxu1 %v1851_v39 }
  0xa5   : > { %769 = vmatprep.mubr.bf16.mxu0 %v1852_v40  ;;  %833 = vmatprep.mubr.bf16.mxu1 %v1854_v41 }
  0xac   : > { %770 = vmatmul.mubr.bf16.gmra.mrb[24].mxu0 %v1856_v42  ;;  %834 = vmatmul.mubr.bf16.gmra.mrb[24].mxu1 %v1857_v43 }
  0xad   : > { %777 = vmatprep.mubr.bf16.mxu0 %v1858_v44  ;;  %841 = vmatprep.mubr.bf16.mxu1 %v1860_v45 }
  0xb4   : > { %778 = vmatmul.mubr.bf16.gmra.mrb[28].mxu0 %v1862_v46  ;;  %842 = vmatmul.mubr.bf16.gmra.mrb[28].mxu1 %v1863_v47 }
 0x14f   : > { %v1609_v48 = vpop.f32.mrb[0].mxu0  ;;  %v1657_v49 = vpop.f32.mrb[0].mxu1 }
 0x150   : > { %v1610_v50 = vpop.f32.mrb[1].mxu0  ;;  %v1658_v52 = vpop.f32.mrb[1].mxu1 }
 0x151   : > { %v1611_v53 = vadd.f32 %v1610_v50, %v1609_v48  ;;  %v1659_v54 = vadd.f32 %v1658_v52, %v1657_v49  ;;  %v1612_v55 = vpop.f32.mrb[2].mxu0  ;;  %v1660_v56 = vpop.f32.mrb[2].mxu1 }
 0x152   : > { %v1613_v58 = vpop.f32.mrb[3].mxu0  ;;  %v1661_v59 = vpop.f32.mrb[3].mxu1 }
 0x153   : > { %v956_v60 = vmul.f32 %v1611_v53, %v2245_v51  ;;  %v972_v61 = vmul.f32 %v1659_v54, %v2245_v51  ;;  %v1614_v62 = vadd.f32 %v1613_v58, %v1612_v55  ;;  %v1662_v63 = vadd.f32 %v1661_v59, %v1660_v56 }
 0x155   : > { %v995_v0 = vadd.f32 %v2250_v57, %v956_v60  ;;  %v1011_v1 = vadd.f32 %v2250_v57, %v972_v61  ;;  %v957_v2 = vmul.f32 %v1614_v62, %v2245_v51  ;;  %v973_v3 = vmul.f32 %v1662_v63, %v2245_v51 }
 0x157   : > { %v996_v4 = vadd.f32 %v2250_v57, %v957_v2  ;;  %v1012_v5 = vadd.f32 %v2250_v57, %v973_v3  ;;  %v1615_v6 = vpop.f32.mrb[4].mxu0  ;;  %v1663_v7 = vpop.f32.mrb[4].mxu1  ;;  %v1027_v8 = vmax.f32 %v995_v0, 0.0  ;;  %v1043_v9 = vmax.f32 %v1011_v1, 0.0 }
 0x158   : > { %v1616_v10 = vpop.f32.mrb[5].mxu0  ;;  %v1664_v11 = vpop.f32.mrb[5].mxu1 }
 0x159   : > { %v1028_v12 = vmax.f32 %v996_v4, 0.0  ;;  %v1044_v13 = vmax.f32 %v1012_v5, 0.0  ;;  %v1617_v14 = vadd.f32 %v1616_v10, %v1615_v6  ;;  %v1665_v15 = vadd.f32 %v1664_v11, %v1663_v7  ;;  %v1618_v16 = vpop.f32.mrb[6].mxu0  ;;  %v1666_v17 = vpop.f32.mrb[6].mxu1 }
 0x15a   : > { %v1619_v18 = vpop.f32.mrb[7].mxu0  ;;  %v1667_v19 = vpop.f32.mrb[7].mxu1 }
 0x15b   : > { %v1501_v20 = vpack.c.bf16 %v1028_v12, %v1027_v8  ;;  %v1541_v21 = vpack.c.bf16 %v1044_v13, %v1043_v9  ;;  %v958_v22 = vmul.f32 %v1617_v14, %v2245_v51  ;;  %v974_v23 = vmul.f32 %v1665_v15, %v2245_v51 }
 0x15c   : > { %v1620_v24 = vadd.f32 %v1619_v18, %v1618_v16  ;;  %v1668_v25 = vadd.f32 %v1667_v19, %v1666_v17 }
 0x15d   : > { %1502 = vst [vmem:[%s2263_s22] sm:$0xff] %v1501_v20   ;;  %1585 = vst [vmem:[%s2263_s22 + $0x40] sm:$0xff] %v1541_v21   ;;  %v997_v26 = vadd.f32 %v2250_v57, %v958_v22  ;;  %v1013_v27 = vadd.f32 %v2250_v57, %v974_v23 }
 0x15e   : > { %v959_v28 = vmul.f32 %v1620_v24, %v2245_v51  ;;  %v975_v29 = vmul.f32 %v1668_v25, %v2245_v51 }
 0x15f   : > { %v1621_v30 = vpop.f32.mrb[8].mxu0  ;;  %v1669_v31 = vpop.f32.mrb[8].mxu1  ;;  %v1029_v40 = vmax.f32 %v997_v26, 0.0  ;;  %v1045_v41 = vmax.f32 %v1013_v27, 0.0 }
 0x160   : > { %v998_v32 = vadd.f32 %v2250_v57, %v959_v28  ;;  %v1014_v33 = vadd.f32 %v2250_v57, %v975_v29  ;;  %v1622_v34 = vpop.f32.mrb[9].mxu0  ;;  %v1670_v35 = vpop.f32.mrb[9].mxu1 }
 0x161   : > { %v1623_v36 = vadd.f32 %v1622_v34, %v1621_v30  ;;  %v1671_v37 = vadd.f32 %v1670_v35, %v1669_v31  ;;  %v1624_v38 = vpop.f32.mrb[10].mxu0  ;;  %v1672_v39 = vpop.f32.mrb[10].mxu1 }
 0x162   : > { %v1030_v42 = vmax.f32 %v998_v32, 0.0  ;;  %v1046_v43 = vmax.f32 %v1014_v33, 0.0  ;;  %v1625_v44 = vpop.f32.mrb[11].mxu0  ;;  %v1673_v45 = vpop.f32.mrb[11].mxu1 }
 0x163   : > { %v960_v46 = vmul.f32 %v1623_v36, %v2245_v51  ;;  %v976_v47 = vmul.f32 %v1671_v37, %v2245_v51  ;;  %v1626_v48 = vadd.f32 %v1625_v44, %v1624_v38  ;;  %v1674_v49 = vadd.f32 %v1673_v45, %v1672_v39 }
 0x164   : > { %v1506_v50 = vpack.c.bf16 %v1030_v42, %v1029_v40  ;;  %v1546_v52 = vpack.c.bf16 %v1046_v43, %v1045_v41 }
 0x165   : > { %v999_v53 = vadd.f32 %v2250_v57, %v960_v46  ;;  %v1015_v54 = vadd.f32 %v2250_v57, %v976_v47  ;;  %v961_v55 = vmul.f32 %v1626_v48, %v2245_v51  ;;  %v977_v56 = vmul.f32 %v1674_v49, %v2245_v51 }
 0x166   : > { %1578 = vst [vmem:[%s2263_s22 + $0x8] sm:$0xff] %v1506_v50   ;;  %1586 = vst [vmem:[%s2263_s22 + $0x48] sm:$0xff] %v1546_v52  }
 0x167   : > { %v1000_v58 = vadd.f32 %v2250_v57, %v961_v55  ;;  %v1016_v59 = vadd.f32 %v2250_v57, %v977_v56  ;;  %v1627_v60 = vpop.f32.mrb[12].mxu0  ;;  %v1675_v61 = vpop.f32.mrb[12].mxu1  ;;  %v1031_v62 = vmax.f32 %v999_v53, 0.0  ;;  %v1047_v63 = vmax.f32 %v1015_v54, 0.0 }
 0x168   : > { %v1628_v0 = vpop.f32.mrb[13].mxu0  ;;  %v1676_v1 = vpop.f32.mrb[13].mxu1 }
 0x169   : > { %v1032_v2 = vmax.f32 %v1000_v58, 0.0  ;;  %v1048_v3 = vmax.f32 %v1016_v59, 0.0  ;;  %v1629_v4 = vadd.f32 %v1628_v0, %v1627_v60  ;;  %v1677_v5 = vadd.f32 %v1676_v1, %v1675_v61  ;;  %v1630_v6 = vpop.f32.mrb[14].mxu0  ;;  %v1678_v7 = vpop.f32.mrb[14].mxu1 }
 0x16a   : > { %v1631_v8 = vpop.f32.mrb[15].mxu0  ;;  %v1679_v9 = vpop.f32.mrb[15].mxu1 }
 0x16b   : > { %v1511_v10 = vpack.c.bf16 %v1032_v2, %v1031_v62  ;;  %v1551_v11 = vpack.c.bf16 %v1048_v3, %v1047_v63  ;;  %v962_v12 = vmul.f32 %v1629_v4, %v2245_v51  ;;  %v978_v13 = vmul.f32 %v1677_v5, %v2245_v51 }
 0x16c   : > { %v1632_v14 = vadd.f32 %v1631_v8, %v1630_v6  ;;  %v1680_v15 = vadd.f32 %v1679_v9, %v1678_v7 }
 0x16d   : > { %1579 = vst [vmem:[%s2263_s22 + $0x10] sm:$0xff] %v1511_v10   ;;  %1587 = vst [vmem:[%s2263_s22 + $0x50] sm:$0xff] %v1551_v11   ;;  %v1001_v16 = vadd.f32 %v2250_v57, %v962_v12  ;;  %v1017_v17 = vadd.f32 %v2250_v57, %v978_v13 }
 0x16e   : > { %v963_v18 = vmul.f32 %v1632_v14, %v2245_v51  ;;  %v979_v19 = vmul.f32 %v1680_v15, %v2245_v51 }
 0x16f   : > { %v1633_v20 = vpop.f32.mrb[16].mxu0  ;;  %v1681_v21 = vpop.f32.mrb[16].mxu1  ;;  %v1033_v30 = vmax.f32 %v1001_v16, 0.0  ;;  %v1049_v31 = vmax.f32 %v1017_v17, 0.0 }
 0x170   : > { %v1002_v22 = vadd.f32 %v2250_v57, %v963_v18  ;;  %v1018_v23 = vadd.f32 %v2250_v57, %v979_v19  ;;  %v1634_v24 = vpop.f32.mrb[17].mxu0  ;;  %v1682_v25 = vpop.f32.mrb[17].mxu1 }
 0x171   : > { %v1635_v26 = vadd.f32 %v1634_v24, %v1633_v20  ;;  %v1683_v27 = vadd.f32 %v1682_v25, %v1681_v21  ;;  %v1636_v28 = vpop.f32.mrb[18].mxu0  ;;  %v1684_v29 = vpop.f32.mrb[18].mxu1 }
 0x172   : > { %v1034_v32 = vmax.f32 %v1002_v22, 0.0  ;;  %v1050_v33 = vmax.f32 %v1018_v23, 0.0  ;;  %v1637_v34 = vpop.f32.mrb[19].mxu0  ;;  %v1685_v35 = vpop.f32.mrb[19].mxu1 }
 0x173   : > { %v964_v36 = vmul.f32 %v1635_v26, %v2245_v51  ;;  %v980_v37 = vmul.f32 %v1683_v27, %v2245_v51  ;;  %v1638_v38 = vadd.f32 %v1637_v34, %v1636_v28  ;;  %v1686_v39 = vadd.f32 %v1685_v35, %v1684_v29 }
 0x174   : > { %v1516_v40 = vpack.c.bf16 %v1034_v32, %v1033_v30  ;;  %v1556_v41 = vpack.c.bf16 %v1050_v33, %v1049_v31 }
 0x175   : > { %v1003_v42 = vadd.f32 %v2250_v57, %v964_v36  ;;  %v1019_v43 = vadd.f32 %v2250_v57, %v980_v37  ;;  %v965_v44 = vmul.f32 %v1638_v38, %v2245_v51  ;;  %v981_v45 = vmul.f32 %v1686_v39, %v2245_v51 }
 0x176   : > { %1580 = vst [vmem:[%s2263_s22 + $0x18] sm:$0xff] %v1516_v40   ;;  %1588 = vst [vmem:[%s2263_s22 + $0x58] sm:$0xff] %v1556_v41  }
 0x177   : > { %v1004_v46 = vadd.f32 %v2250_v57, %v965_v44  ;;  %v1020_v47 = vadd.f32 %v2250_v57, %v981_v45  ;;  %v1639_v48 = vpop.f32.mrb[20].mxu0  ;;  %v1687_v49 = vpop.f32.mrb[20].mxu1  ;;  %v1035_v50 = vmax.f32 %v1003_v42, 0.0  ;;  %v1051_v52 = vmax.f32 %v1019_v43, 0.0 }
 0x178   : > { %v1640_v53 = vpop.f32.mrb[21].mxu0  ;;  %v1688_v54 = vpop.f32.mrb[21].mxu1 }
 0x179   : > { %v1036_v55 = vmax.f32 %v1004_v46, 0.0  ;;  %v1052_v56 = vmax.f32 %v1020_v47, 0.0  ;;  %v1641_v58 = vadd.f32 %v1640_v53, %v1639_v48  ;;  %v1689_v59 = vadd.f32 %v1688_v54, %v1687_v49  ;;  %v1642_v60 = vpop.f32.mrb[22].mxu0  ;;  %v1690_v61 = vpop.f32.mrb[22].mxu1 }
 0x17a   : > { %v1643_v62 = vpop.f32.mrb[23].mxu0  ;;  %v1691_v63 = vpop.f32.mrb[23].mxu1 }
 0x17b   : > { %v1521_v0 = vpack.c.bf16 %v1036_v55, %v1035_v50  ;;  %v1561_v1 = vpack.c.bf16 %v1052_v56, %v1051_v52  ;;  %v966_v2 = vmul.f32 %v1641_v58, %v2245_v51  ;;  %v982_v3 = vmul.f32 %v1689_v59, %v2245_v51 }
 0x17c   : > { %v1644_v4 = vadd.f32 %v1643_v62, %v1642_v60  ;;  %v1692_v5 = vadd.f32 %v1691_v63, %v1690_v61 }
 0x17d   : > { %1581 = vst [vmem:[%s2263_s22 + $0x20] sm:$0xff] %v1521_v0   ;;  %1589 = vst [vmem:[%s2263_s22 + $0x60] sm:$0xff] %v1561_v1   ;;  %v1005_v6 = vadd.f32 %v2250_v57, %v966_v2  ;;  %v1021_v7 = vadd.f32 %v2250_v57, %v982_v3 }
 0x17e   : > { %v967_v8 = vmul.f32 %v1644_v4, %v2245_v51  ;;  %v983_v9 = vmul.f32 %v1692_v5, %v2245_v51 }
 0x17f   : > { %v1645_v10 = vpop.f32.mrb[24].mxu0  ;;  %v1693_v11 = vpop.f32.mrb[24].mxu1  ;;  %v1037_v20 = vmax.f32 %v1005_v6, 0.0  ;;  %v1053_v21 = vmax.f32 %v1021_v7, 0.0 }
 0x180   : > { %v1006_v12 = vadd.f32 %v2250_v57, %v967_v8  ;;  %v1022_v13 = vadd.f32 %v2250_v57, %v983_v9  ;;  %v1646_v14 = vpop.f32.mrb[25].mxu0  ;;  %v1694_v15 = vpop.f32.mrb[25].mxu1 }
 0x181   : > { %v1647_v16 = vadd.f32 %v1646_v14, %v1645_v10  ;;  %v1695_v17 = vadd.f32 %v1694_v15, %v1693_v11  ;;  %v1648_v18 = vpop.f32.mrb[26].mxu0  ;;  %v1696_v19 = vpop.f32.mrb[26].mxu1 }
 0x182   : > { %v1038_v22 = vmax.f32 %v1006_v12, 0.0  ;;  %v1054_v23 = vmax.f32 %v1022_v13, 0.0  ;;  %v1649_v24 = vpop.f32.mrb[27].mxu0  ;;  %v1697_v25 = vpop.f32.mrb[27].mxu1 }
 0x183   : > { %v968_v26 = vmul.f32 %v1647_v16, %v2245_v51  ;;  %v984_v27 = vmul.f32 %v1695_v17, %v2245_v51  ;;  %v1650_v28 = vadd.f32 %v1649_v24, %v1648_v18  ;;  %v1698_v29 = vadd.f32 %v1697_v25, %v1696_v19 }
 0x184   : > { %v1526_v30 = vpack.c.bf16 %v1038_v22, %v1037_v20  ;;  %v1566_v31 = vpack.c.bf16 %v1054_v23, %v1053_v21 }
 0x185   : > { %v1007_v32 = vadd.f32 %v2250_v57, %v968_v26  ;;  %v1023_v33 = vadd.f32 %v2250_v57, %v984_v27  ;;  %v969_v34 = vmul.f32 %v1650_v28, %v2245_v51  ;;  %v985_v35 = vmul.f32 %v1698_v29, %v2245_v51 }
 0x186   : > { %1582 = vst [vmem:[%s2263_s22 + $0x28] sm:$0xff] %v1526_v30   ;;  %1590 = vst [vmem:[%s2263_s22 + $0x68] sm:$0xff] %v1566_v31  }
 0x187   : > { %v1008_v36 = vadd.f32 %v2250_v57, %v969_v34  ;;  %v1024_v37 = vadd.f32 %v2250_v57, %v985_v35  ;;  %v1651_v38 = vpop.f32.mrb[28].mxu0  ;;  %v1699_v39 = vpop.f32.mrb[28].mxu1  ;;  %v1039_v40 = vmax.f32 %v1007_v32, 0.0  ;;  %v1055_v41 = vmax.f32 %v1023_v33, 0.0 }
 0x188   : > { %v1652_v42 = vpop.f32.mrb[29].mxu0  ;;  %v1700_v43 = vpop.f32.mrb[29].mxu1 }
 0x189   : > { %v1040_v44 = vmax.f32 %v1008_v36, 0.0  ;;  %v1056_v45 = vmax.f32 %v1024_v37, 0.0  ;;  %v1653_v46 = vadd.f32 %v1652_v42, %v1651_v38  ;;  %v1701_v47 = vadd.f32 %v1700_v43, %v1699_v39  ;;  %v1654_v48 = vpop.f32.mrb[30].mxu0  ;;  %v1702_v49 = vpop.f32.mrb[30].mxu1 }
 0x18a   : > { %v1655_v50 = vpop.f32.mrb[31].mxu0  ;;  %v1703_v52 = vpop.f32.mrb[31].mxu1 }
 0x18b   : > { %v1531_v53 = vpack.c.bf16 %v1040_v44, %v1039_v40  ;;  %v1571_v54 = vpack.c.bf16 %v1056_v45, %v1055_v41  ;;  %v970_v55 = vmul.f32 %v1653_v46, %v2245_v51  ;;  %v986_v56 = vmul.f32 %v1701_v47, %v2245_v51 }
 0x18c   : > { %v1656_v58 = vadd.f32 %v1655_v50, %v1654_v48  ;;  %v1704_v59 = vadd.f32 %v1703_v52, %v1702_v49 }
 0x18d   : > { %1583 = vst [vmem:[%s2263_s22 + $0x30] sm:$0xff] %v1531_v53   ;;  %1591 = vst [vmem:[%s2263_s22 + $0x70] sm:$0xff] %v1571_v54   ;;  %v1009_v60 = vadd.f32 %v2250_v57, %v970_v55  ;;  %v1025_v61 = vadd.f32 %v2250_v57, %v986_v56 }
 0x18e   : > { %v971_v62 = vmul.f32 %v1656_v58, %v2245_v51  ;;  %v987_v63 = vmul.f32 %v1704_v59, %v2245_v51 }
 0x18f   : > { %v1041_v2 = vmax.f32 %v1009_v60, 0.0  ;;  %v1057_v3 = vmax.f32 %v1025_v61, 0.0 }
 0x190   : > { %v1010_v0 = vadd.f32 %v2250_v57, %v971_v62  ;;  %v1026_v1 = vadd.f32 %v2250_v57, %v987_v63 }
 0x192   : > { %v1042_v4 = vmax.f32 %v1010_v0, 0.0  ;;  %v1058_v5 = vmax.f32 %v1026_v1, 0.0 }
 0x194   : > { %v1536_v51 = vpack.c.bf16 %v1042_v4, %v1041_v2  ;;  %v1576_v6 = vpack.c.bf16 %v1058_v5, %v1057_v3 }
 0x196   : > { %1584 = vst [vmem:[%s2263_s22 + $0x38] sm:$0xff] %v1536_v51   ;;  %1592 = vst [vmem:[%s2263_s22 + $0x78] sm:$0xff] %v1576_v6  }
 0x197   : > { %1935 = shalt.err (!%p1932_p5)
}
 0x198   : > { %s1936_s23 = scalar_lea.hbm %s2338_s6, 2048  ;;  %s1940_s14 = scalar_lea.hbm %s2395_s4, 4096 }
 0x199   : > { %p1937_p9 = scmp.ne.s32.totalorder %s2338_s6, %s1936_s23  ;;  %p1941_p3 = scmp.lt.u32.totalorder %s2338_s6, %s2395_s4 }
 0x19a   : > { %p1942_p7 = scmp.lt.u32.totalorder %s1940_s14, %s1936_s23  ;;  %p1944_p4 = scmp.lt.u32.totalorder %s1936_s23, %s2338_s6 }
 0x19b   : > { %p1938_p1 = pnand %p1937_p9, %p2140_p10 }
 0x19c   : > { %p1943_p13 = por %p1942_p7, %p1941_p3 }
 0x19d   : > { %p1939_p2 = pneg %p1938_p1 }
 0x19e   : > { %p1945_p6 = por %p1944_p4, %p1943_p13 }
 0x1a0   : > { %p1946_p8 = pnand %p1945_p6, %p1939_p2 }
 0x1a2   : > { %1949 = shalt.err (!%p1946_p8)
}
 0x1a3   : > { %s2017_s28 = smov 64   ;;  %s2018_s24 = smov 4  }
 0x1a4   : > { %1727 = dma.vmem_to_hbm [thread:$0]  (%p2140_p10), %s2340_s13, 2048, %s2338_s6, %s1220_s18, %s2017_s28, %s2017_s28, %s2018_s24  }
 0x1a5 PF: > { %s1249_s30 = sand.u32 1, %s1988_s15   ;;  %p2413_p12 = scmp.ne.s32.totalorder %s2403_s26, 0 }
 0x1a6   : > { %p2414_p11 = scmp.ge.s32.totalorder %s2008_s20, 2  ;;  %s1250_s9 = scalar_lea.sflag [#allocation5], %s1249_s30 }
 0x1a8   : > { %p1738_p0 = pnand %p2414_p11, %p2413_p12 }
 0x1aa   : > { %1983 = dma.done.wait (!%p1738_p0), %s1250_s9, 2048  }
 0x1ab   : > { %1985 = vsyncadd (!%p1738_p0), %s1250_s9, 4294965248  ;;  %s21_s20 = sadd.s32 1, %s2008_s20   ;;  %s2415_s15 = smov %s1992_s16 }
 0x1ac   : > { %p18_p5 = scmp.ge.s32.totalorder %s21_s20, 4   ;;  %s2416_s16 = smov %s1996_s17 }
 0x1ad   : > { %s2417_s17 = smov %s2149_s10  ;;  %s2418_s18 = smov %s2004_s19 }
 0x1ae   : > { %s2419_s19 = smov %s2421_s5  ;;  %20 = sbr.rel (!%p18_p5) target bundleno = 7 (0x7), region = 100 }
 0x1b5   :  { %1255 = vsyncpa [#allocation4], 1 }
 0x1b6   :  { %1257 = vsyncpa [#allocation4 + $0x1], 1 }
 0x1b7   :  { %1258 = vsyncpa [#allocation7], 1 }
 0x1b8   :  { %1259 = vsyncpa [#allocation5], 1 }
 0x1b9   :  { %1261 = vsyncpa [#allocation5 + $0x1], 1 }

</bundles_post_ra>
